<compile_context>
chip_gen: v5e
topology: v5e:2x2
jax: 0.10.0
libtpu: 0.0.40
codegen_flags: <defaults>
</compile_context>

<pallas_src>
import functools

import jax
import jax.numpy as jnp
from jax.experimental import pallas as pl
from jax.experimental.pallas import tpu as pltpu

SMOOTHING = 0.1


def _round_up(x, m):
    return ((x + m - 1) // m) * m


def _sublane_multiple(dtype):
    itemsize = jnp.dtype(dtype).itemsize
    if itemsize >= 4:
        return 8
    if itemsize == 2:
        return 16
    return 32


def _device_params():
    """(target_tile_bytes, vmem_limit_bytes, num_tensorcores) for this chip."""
    try:
        kind = jax.devices()[0].device_kind.lower()
    except Exception:
        kind = ""
    if "v7" in kind or "7x" in kind:
        # 64 MiB physical VMEM, 2 TensorCores/chip -> split rows across cores
        return 4 << 20, 48 * 1024 * 1024, 2
    if "v6" in kind:
        # 128 MiB physical VMEM, 1 TC
        return 6 << 20, 80 * 1024 * 1024, 1
    if "v5" in kind or "v4" in kind:
        return 6 << 20, 80 * 1024 * 1024, 1
    # unknown chip: conservative, known-good defaults
    return 2 << 20, 32 * 1024 * 1024, 1


def _pick_blocks(n, c, dtype, target_tile_bytes):
    """Choose (block_rows, block_cols) giving roughly target-sized input tiles."""
    itemsize = jnp.dtype(dtype).itemsize
    sub = _sublane_multiple(dtype)
    # class (lane) axis: full dim if it fits one vreg row, else 128-multiple
    if c <= 128:
        block_c = c
    else:
        block_c = min(_round_up(c, 128), 2048)
    # row (sublane) axis: fill the byte budget, multiple of the dtype sublane
    # packing, capped by the (rounded) array extent
    max_rows = _round_up(n, sub)
    block_r = target_tile_bytes // (itemsize * max(block_c, 1))
    block_r = max(sub, (block_r // sub) * sub)
    block_r = min(block_r, max_rows, 4096)
    return block_r, block_c


def _make_kernel(n, c, block_r, block_c, tiles_per_core, any_ragged, smoothing):
    r_groups = block_r // 8  # block_r is always a multiple of 8

    def kernel(logits_ref, targets_ref, out_ref, acc_ref):
        g = pl.program_id(0)   # core split ("parallel")
        i = pl.program_id(1)   # row tiles (reduction)
        j = pl.program_id(2)   # class tiles (reduction)

        @pl.when((i == 0) & (j == 0))
        def _init():
            acc_ref[...] = jnp.zeros_like(acc_ref)

        x = logits_ref[...].astype(jnp.float32)
        t = targets_ref[...].astype(jnp.float32)

        # label smoothing: t * (1 - s) + s / 2
        ts = t * (1.0 - smoothing) + smoothing * 0.5

        # numerically-stable BCE with logits (same formula PyTorch uses):
        #   loss = max(x, 0) - x * ts + log(1 + exp(-|x|))
        loss = jnp.maximum(x, 0.0) - x * ts + jnp.log1p(jnp.exp(-jnp.abs(x)))

        def _accumulate(vals):
            # sublane partial-reduce: (block_r, block_c) -> (8, block_c),
            # pure VPU vreg adds; the single cross-lane reduce is deferred to
            # the one-time finalize below.
            acc_ref[...] += vals.reshape(r_groups, 8, block_c).sum(axis=0)

        if not any_ragged:
            # fully-aligned problem: no masking anywhere
            _accumulate(loss)
        else:
            row_tile = g * tiles_per_core + i
            needs_mask = ((row_tile + 1) * block_r > n) | ((j + 1) * block_c > c)

            @pl.when(jnp.logical_not(needs_mask))
            def _interior():
                _accumulate(loss)

            @pl.when(needs_mask)
            def _boundary():
                rows = row_tile * block_r + jax.lax.broadcasted_iota(
                    jnp.int32, (block_r, block_c), 0)
                cols = j * block_c + jax.lax.broadcasted_iota(
                    jnp.int32, (block_r, block_c), 1)
                mask = (rows < n) & (cols < c)
                _accumulate(jnp.where(mask, loss, 0.0))

        @pl.when((i == pl.num_programs(1) - 1) & (j == pl.num_programs(2) - 1))
        def _finalize():
            out_ref[0, 0] = jnp.sum(acc_ref[...])

    return kernel


@functools.partial(jax.jit, static_argnames=("smoothing",))
def label_smoothing_loss(logits, targets, *, smoothing=SMOOTHING):
    """Mean-reduced BCE-with-logits on label-smoothed targets (Pallas TPU)."""
    assert logits.shape == targets.shape
    n, c = logits.shape

    target_tile_bytes, vmem_limit, num_tc = _device_params()
    block_r, block_c = _pick_blocks(n, c, logits.dtype, target_tile_bytes)
    row_tiles = pl.cdiv(n, block_r)
    col_tiles = pl.cdiv(c, block_c)

    # split row tiles across TensorCores only when the chip actually has >1
    # (v7x); on single-TC chips this keeps a trivial size-1 axis and avoids
    # re-DMAing a clamped duplicate tile.
    num_cores = num_tc if row_tiles >= num_tc else 1
    tiles_per_core = pl.cdiv(row_tiles, num_cores)

    any_ragged = (
        (n % block_r != 0)
        or (c % block_c != 0)
        or (num_cores * tiles_per_core != row_tiles)
    )

    def in_map(g, i, j):
        # clamp so the (possibly empty) extra tiles of the last core stay in
        # bounds; their contribution is masked to zero in the kernel.
        return (jnp.minimum(g * tiles_per_core + i, row_tiles - 1), j)

    kernel = _make_kernel(n, c, block_r, block_c, tiles_per_core,
                          any_ragged, smoothing)

    partials = pl.pallas_call(
        kernel,
        out_shape=jax.ShapeDtypeStruct((num_cores, 1), jnp.float32),
        grid_spec=pltpu.PrefetchScalarGridSpec(
            num_scalar_prefetch=0,
            grid=(num_cores, tiles_per_core, col_tiles),
            in_specs=[
                pl.BlockSpec((block_r, block_c), in_map),
                pl.BlockSpec((block_r, block_c), in_map),
            ],
            out_specs=pl.BlockSpec((1, 1), lambda g, i, j: (g, 0),
                                   memory_space=pltpu.SMEM),
            # small per-lane partial accumulator (not a full block)
            scratch_shapes=[pltpu.VMEM((8, block_c), jnp.float32)],
        ),
        compiler_params=pltpu.CompilerParams(
            dimension_semantics=("parallel", "arbitrary", "arbitrary"),
            vmem_limit_bytes=vmem_limit,
        ),
    )(logits, targets)

    # mean reduction over all elements (scalar glue in plain JAX)
    return jnp.sum(partials) / (n * c)


def _reference(logits, targets, smoothing=SMOOTHING):
    x = logits.astype(jnp.float32)
    ts = targets.astype(jnp.float32) * (1.0 - smoothing) + smoothing * 0.5
    loss = jnp.maximum(x, 0.0) - x * ts + jnp.log1p(jnp.exp(-jnp.abs(x)))
    return jnp.mean(loss)


if __name__ == "__main__":
    key = jax.random.PRNGKey(0)
    k1, k2, k3, k4, k5, k6 = jax.random.split(key, 6)

    # aligned small case (interior fast path, no masking code emitted)
    N, C = 16, 128
    logits = jax.random.normal(k1, (N, C), dtype=jnp.float32)
    targets = (jax.random.uniform(k2, (N, C)) > 0.5).astype(jnp.float32)
    out = jax.block_until_ready(label_smoothing_loss(logits, targets))
    ref = _reference(logits, targets)
    assert jnp.allclose(out, ref, rtol=1e-5, atol=1e-5), (out, ref)

    # ragged / unaligned case (boundary masking path)
    N2, C2 = 23, 200
    logits2 = jax.random.normal(k3, (N2, C2), dtype=jnp.float32)
    targets2 = (jax.random.uniform(k4, (N2, C2)) > 0.5).astype(jnp.float32)
    out2 = jax.block_until_ready(label_smoothing_loss(logits2, targets2))
    ref2 = _reference(logits2, targets2)
    assert jnp.allclose(out2, ref2, rtol=1e-5, atol=1e-5), (out2, ref2)

    # bf16 inputs (halves HBM traffic; exercises the 16-row sublane multiple)
    N3, C3 = 30, 160
    logits3 = jax.random.normal(k5, (N3, C3), dtype=jnp.float32).astype(jnp.bfloat16)
    targets3 = (jax.random.uniform(k6, (N3, C3)) > 0.5).astype(jnp.bfloat16)
    out3 = jax.block_until_ready(label_smoothing_loss(logits3, targets3))
    ref3 = _reference(logits3, targets3)
    assert jnp.allclose(out3, ref3, rtol=1e-4, atol=1e-4), (out3, ref3)

    print("KERNEL_OK")
</pallas_src>

<mosaic_0001>
module attributes {stable_mosaic.version = 11 : i64} {
  func.func @kernel(%arg0: i32, %arg1: i32, %arg2: i32, %arg3: memref<16x128xf32, #tpu.memory_space<vmem>>, %arg4: memref<16x128xf32, #tpu.memory_space<vmem>>, %arg5: memref<1x1xf32, #tpu.memory_space<smem>>, %arg6: memref<8x128xf32, #tpu.memory_space<vmem>>) attributes {dimension_semantics = [#tpu.dimension_semantics<parallel>, #tpu.dimension_semantics<arbitrary>, #tpu.dimension_semantics<arbitrary>], iteration_bounds = array<i64: 1, 1, 1>, scalar_prefetch = 0 : i64, scratch_operands = 1 : i64, tpu.core_type = #tpu.core_type<tc>, window_params = [{transform_indices = @transform_0, window_bounds = array<i64: 16, 128>}, {transform_indices = @transform_1, window_bounds = array<i64: 16, 128>}, {transform_indices = @transform_2, window_bounds = array<i64: 1, 1>}]} {
    %c0_i32 = arith.constant 0 : i32
    %0 = arith.cmpi eq, %arg1, %c0_i32 : i32
    %c0_i32_0 = arith.constant 0 : i32
    %1 = arith.cmpi eq, %arg2, %c0_i32_0 : i32
    %2 = arith.andi %0, %1 : i1
    %3 = arith.extui %2 : i1 to i32
    %c0_i32_1 = arith.constant 0 : i32
    %4 = arith.cmpi ne, %3, %c0_i32_1 : i32
    scf.if %4 {
      %cst_16 = arith.constant 0.000000e+00 : f32
      %31 = vector.broadcast %cst_16 : f32 to vector<8x128xf32>
      %c0_17 = arith.constant 0 : index
      %c0_18 = arith.constant 0 : index
      %32 = vector.load %arg6[%c0_17, %c0_18] : memref<8x128xf32, #tpu.memory_space<vmem>>, vector<8x128xf32>
      tpu.vector_store %arg6[%c0_17, %c0_18], %31 {strides = array<i32>} : memref<8x128xf32, #tpu.memory_space<vmem>>, vector<8x128xf32>,
    } else {
    }
    %c0 = arith.constant 0 : index
    %c0_2 = arith.constant 0 : index
    %5 = vector.load %arg3[%c0, %c0_2] : memref<16x128xf32, #tpu.memory_space<vmem>>, vector<16x128xf32>
    %c0_3 = arith.constant 0 : index
    %c0_4 = arith.constant 0 : index
    %6 = vector.load %arg4[%c0_3, %c0_4] : memref<16x128xf32, #tpu.memory_space<vmem>>, vector<16x128xf32>
    %cst = arith.constant 0.899999976 : f32
    %7 = vector.broadcast %cst : f32 to vector<16x128xf32>
    %8 = arith.mulf %6, %7 : vector<16x128xf32>
    %cst_5 = arith.constant 5.000000e-02 : f32
    %9 = vector.broadcast %cst_5 : f32 to vector<16x128xf32>
    %10 = arith.addf %8, %9 : vector<16x128xf32>
    %cst_6 = arith.constant 0.000000e+00 : f32
    %11 = vector.broadcast %cst_6 : f32 to vector<16x128xf32>
    %12 = arith.maximumf %5, %11 : vector<16x128xf32>
    %13 = arith.mulf %5, %10 : vector<16x128xf32>
    %14 = arith.subf %12, %13 : vector<16x128xf32>
    %15 = math.absf %5 : vector<16x128xf32>
    %cst_7 = arith.constant 0.000000e+00 : f32
    %16 = vector.broadcast %cst_7 : f32 to vector<16x128xf32>
    %17 = arith.subf %16, %15 : vector<16x128xf32>
    %18 = math.exp %17 : vector<16x128xf32>
    %19 = math.log1p %18 : vector<16x128xf32>
    %20 = arith.addf %14, %19 : vector<16x128xf32>
    %c0_8 = arith.constant 0 : index
    %c0_9 = arith.constant 0 : index
    %21 = vector.load %arg6[%c0_8, %c0_9] : memref<8x128xf32, #tpu.memory_space<vmem>>, vector<8x128xf32>
    %22 = vector.shape_cast %20 : vector<16x128xf32> to vector<2x8x128xf32>
    %cst_10 = arith.constant dense<0.000000e+00> : vector<8x128xf32>
    %23 = vector.multi_reduction <add>, %22, %cst_10 [0] : vector<2x8x128xf32> to vector<8x128xf32>
    %24 = arith.addf %21, %23 : vector<8x128xf32>
    %c0_11 = arith.constant 0 : index
    %c0_12 = arith.constant 0 : index
    %25 = vector.load %arg6[%c0_11, %c0_12] : memref<8x128xf32, #tpu.memory_space<vmem>>, vector<8x128xf32>
    tpu.vector_store %arg6[%c0_11, %c0_12], %24 {strides = array<i32>} : memref<8x128xf32, #tpu.memory_space<vmem>>, vector<8x128xf32>,
    %c0_i32_13 = arith.constant 0 : i32
    %26 = arith.cmpi eq, %arg1, %c0_i32_13 : i32
    %c0_i32_14 = arith.constant 0 : i32
    %27 = arith.cmpi eq, %arg2, %c0_i32_14 : i32
    %28 = arith.andi %26, %27 : i1
    %29 = arith.extui %28 : i1 to i32
    %c0_i32_15 = arith.constant 0 : i32
    %30 = arith.cmpi ne, %29, %c0_i32_15 : i32
    scf.if %30 {
      %c0_16 = arith.constant 0 : index
      %c0_17 = arith.constant 0 : index
      %31 = vector.load %arg6[%c0_16, %c0_17] : memref<8x128xf32, #tpu.memory_space<vmem>>, vector<8x128xf32>
      %32 = vector.shape_cast %31 : vector<8x128xf32> to vector<1x8x128xf32>
      %cst_18 = arith.constant dense<0.000000e+00> : vector<1xf32>
      %33 = vector.multi_reduction <add>, %32, %cst_18 [1, 2] : vector<1x8x128xf32> to vector<1xf32>
      %34 = vector.shape_cast %33 : vector<1xf32> to vector<1x1x1xf32>
      %35 = vector.extract %34[0, 0, 0] : f32 from vector<1x1x1xf32>
      %c0_19 = arith.constant 0 : index
      %c0_20 = arith.constant 0 : index
      %36 = memref.load %arg5[%c0_19, %c0_20] : memref<1x1xf32, #tpu.memory_space<smem>>
      memref.store %35, %arg5[%c0_19, %c0_20] : memref<1x1xf32, #tpu.memory_space<smem>>
    } else {
    }
    return
  }
  func.func @transform_0(%arg0: i32, %arg1: i32, %arg2: i32) -> (i32, i32) {
    %c1_i32 = arith.constant 1 : i32
    %0 = arith.muli %arg0, %c1_i32 : i32
    %1 = arith.addi %0, %arg1 : i32
    %c0_i32 = arith.constant 0 : i32
    %2 = arith.minsi %1, %c0_i32 : i32
    %c0_i32_0 = arith.constant 0 : i32
    return %2, %arg2 : i32, i32
  }
  func.func @transform_1(%arg0: i32, %arg1: i32, %arg2: i32) -> (i32, i32) {
    %c1_i32 = arith.constant 1 : i32
    %0 = arith.muli %arg0, %c1_i32 : i32
    %1 = arith.addi %0, %arg1 : i32
    %c0_i32 = arith.constant 0 : i32
    %2 = arith.minsi %1, %c0_i32 : i32
    %c0_i32_0 = arith.constant 0 : i32
    return %2, %arg2 : i32, i32
  }
  func.func @transform_2(%arg0: i32, %arg1: i32, %arg2: i32) -> (i32, i32) {
    %c0_i32 = arith.constant 0 : i32
    %c0_i32_0 = arith.constant 0 : i32
    return %arg0, %c0_i32 : i32, i32
  }
}

</mosaic_0001>

<bundles_post_ra>
// kernel: label_smoothing_loss.1
= control target key start
LH: loop header
LB: loop body
LE: loop exit
PB: predicated region body
PF: predicated region fallthrough
CT: control target
= control target key end

     0   :  { %7 = vsyncpa [#allocation4], 0  ;;  %s262_s0 = inlined_call_operand.hbm [shape: f32[16,128], index: 0, kind: input, shape index: {}]   ;;  %s263_s1 = inlined_call_operand.hbm [shape: f32[16,128], index: 1, kind: input, shape index: {}]   ;;  %s264_s2 = inlined_call_operand.hbm [shape: f32[1,1], index: 2, kind: output, shape index: {}]  }
   0x1   :  { %8 = vsyncpa [#allocation7], 0 }
   0x2   :  { %9 = vsyncpa [#allocation5], 0  ;;  %s20_s11 = sshll.u32 %s262_s0, 4  ;;  %s233_s12 = smov [#allocation3]   ;;  %s21_s11 = int_to_ptr.hbm [resolvable:$true] %s20_s11 }
   0x3   :  { %s22_s13 = sshll.u32 %s233_s12, 4  ;;  %s39_s16 = sshll.u32 %s263_s1, 4  ;;  %s23_s13 = int_to_ptr.vmem [resolvable:$true] %s22_s13  ;;  %s40_s16 = int_to_ptr.hbm [resolvable:$true] %s39_s16 }
   0x4   :  { %s234_s17 = smov 128   ;;  %s235_s18 = smov 8  }
   0x5   :  { %28 = dma.hbm_to_vmem [thread:$0]  %s21_s11, 256, %s23_s13, [#allocation4], %s234_s17, %s234_s17, %s235_s18  }
   0x6   :  { %s236_s19 = smov [#allocation6]  }
   0x7   :  { %s41_s20 = sshll.u32 %s236_s19, 4  ;;  %s42_s20 = int_to_ptr.vmem [resolvable:$true] %s41_s20 }
   0x8   :  { %47 = dma.hbm_to_vmem [thread:$0]  %s40_s16, 256, %s42_s20, [#allocation7], %s234_s17, %s234_s17, %s235_s18  }
   0x9   :  { %227 = dma.done.wait [#allocation4], 256  }
   0xa   :  { %228 = vsyncadd [#allocation4], 4294967040 }
   0xb   :  { %229 = dma.done.wait [#allocation7], 256  }
   0xc   :  { %230 = vsyncadd [#allocation7], 4294967040  ;;  %v71_v0 = vld [vmem:[#allocation3] sm:$0xff]  ;;  %v72_v1 = vld [vmem:[#allocation3 + $0x8] sm:$0xff]  ;;  %s136_s21 = sshll.u32 %s264_s2, 4  ;;  %s237_s23 = smov [#allocation8]   ;;  %s137_s21 = int_to_ptr.hbm [resolvable:$true] %s136_s21 }
   0xd   :  { %v85_v2 = vand.u32 2147483647, %v71_v0  ;;  %v86_v3 = vand.u32 2147483647, %v72_v1  ;;  %v73_v8 = vld [vmem:[#allocation6] sm:$0xff]  ;;  %v74_v9 = vld [vmem:[#allocation6 + $0x8] sm:$0xff] }
   0xe   :  { %v75_v10 = vmul.f32 0.9, %v73_v8  ;;  %v76_v11 = vmul.f32 0.9, %v74_v9  ;;  %v79_v21 = vmax.f32 %v71_v0, 0.0  ;;  %v80_v25 = vmax.f32 %v72_v1, 0.0 }
   0xf   :  { %v87_v4 = vsub.f32 0.0, %v85_v2  ;;  %v88_v5 = vsub.f32 0.0, %v86_v3 }
  0x10   :  { %v77_v14 = vadd.f32 0.05, %v75_v10  ;;  %v78_v17 = vadd.f32 0.05, %v76_v11 }
  0x11   :  { %v89_v6 = vmul.f32 1.442695, %v87_v4  ;;  %v91_v7 = vmul.f32 1.442695, %v88_v5 }
  0x12   :  { %v81_v22 = vmul.f32 %v77_v14, %v71_v0  ;;  %v82_v26 = vmul.f32 %v78_v17, %v72_v1 }
  0x13   :  { %159 = vpow2.f32 %v89_v6 }
  0x14   :  { %161 = vpow2.f32 %v91_v7  ;;  %v83_v30 = vsub.f32 %v79_v21, %v81_v22  ;;  %v84_v33 = vsub.f32 %v80_v25, %v82_v26 }
  0x19   :  { %v160_v12 = vpop.eup %159 }
  0x1a   :  { %v162_v13 = vpop.eup %161  ;;  %v93_v15 = vadd.f32 1.0, %v160_v12  ;;  %v96_v16 = vmul.f32 -0.5, %v160_v12  ;;  %v99_v23 = vand.u32 2147483647, %v160_v12 }
  0x1b   :  { %v102_v18 = vadd.f32 1.0, %v162_v13  ;;  %v105_v19 = vmul.f32 -0.5, %v162_v13  ;;  %v108_v27 = vand.u32 2147483647, %v162_v13 }
  0x1c   :  { %163 = vlog2.f32 %v93_v15  ;;  %v97_v20 = vadd.f32 1.0, %v96_v16  ;;  %vm100_vm0 = vcmp.lt.f32.partialorder %v99_v23, 0.0004427343 }
  0x1d   :  { %165 = vlog2.f32 %v102_v18  ;;  %v106_v24 = vadd.f32 1.0, %v105_v19  ;;  %vm109_vm1 = vcmp.lt.f32.partialorder %v108_v27, 0.0004427343 }
  0x1e   :  { %v98_v28 = vmul.f32 %v160_v12, %v97_v20 }
  0x1f   :  { %v107_v31 = vmul.f32 %v162_v13, %v106_v24 }
  0x22   :  { %v164_v29 = vpop.eup %163 }
  0x23   :  { %v166_v32 = vpop.eup %165  ;;  %v95_v34 = vmul.f32 0.6931472, %v164_v29 }
  0x24   :  { %v104_v35 = vmul.f32 0.6931472, %v166_v32 }
  0x25   :  { %v101_v36 = vsel %vm100_vm0, %v98_v28, %v95_v34 }
  0x26   :  { %v110_v37 = vsel %vm109_vm1, %v107_v31, %v104_v35  ;;  %v111_v38 = vadd.f32 %v101_v36, %v83_v30 }
  0x27   :  { %v112_v39 = vadd.f32 %v110_v37, %v84_v33 }
  0x29   :  { %v114_v40 = vadd.f32 %v112_v39, %v111_v38 }
  0x2b   :  { %120 = vadd.xlane.f32.xlu0 %v114_v40 }
  0x9e   :  { %v121_v41 = vpop.xlane.xlu0 %120 }
  0x9f   :  { %v122_v42 = vrot.slane %v121_v41, 4 }
  0xa1   :  { %v123_v43 = vadd.f32 %v122_v42, %v121_v41 }
  0xa3   :  { %v124_v44 = vrot.slane %v123_v43, 2 }
  0xa5   :  { %v125_v45 = vadd.f32 %v124_v44, %v123_v43 }
  0xa7   :  { %v126_v46 = vrot.slane %v125_v45, 1 }
  0xa9   :  { %v127_v47 = vadd.f32 %v126_v46, %v125_v45 }
  0xab   :  { %152 = vpush %v127_v47 }
  0xdc   :  { %s153_s22 = spop %152 }
  0xdd   :  { %130 = sst [smem:[#allocation8]] %s153_s22 }
  0xde   :  { %139 = dma.smem_to_hbm %s237_s23, 16, %s137_s21, [#allocation5]  }
  0xdf   :  { %231 = dma.done.wait [#allocation5], 16  }
  0xe0   :  { %232 = vsyncadd [#allocation5], 4294967280 }
  0xe1   :  { %144 = sfence }
  0xe2   :  { %145 = vsyncpa [#allocation4], 1 }
  0xe3   :  { %146 = vsyncpa [#allocation7], 1 }
  0xe4   :  { %147 = vsyncpa [#allocation5], 1 }

</bundles_post_ra>
